<compile_context>
chip_gen: v7x
topology: tpu7x:2x2x1
jax: 0.10.0
libtpu: 0.0.40
codegen_flags: <defaults>
</compile_context>

<pallas_src>
import jax
import jax.numpy as jnp
from jax.experimental import pallas as pl
from jax.experimental.pallas import tpu as pltpu


def _cdiv(a, b):
    return (a + b - 1) // b


def _round_up(a, b):
    return _cdiv(a, b) * b


def concat4_head_kernel(x_ref, w1_ref, b1_ref, w2_ref, b2_ref, o_ref):
    """One (batch-tile, N-chunk) grid step of logits = tanh(x @ W1 + b1) @ W2 + b2.

    x_ref : (TB, K)  bf16  CLS features [cls(-1) | cls(-2) | cls(-3) | cls(-4)]
    w1_ref: (K, TN)  bf16  dense-weight column chunk n*TN:(n+1)*TN
    b1_ref: (1, TN)  f32   dense-bias chunk
    w2_ref: (TN, Lp) bf16  out_proj rows matching this N-chunk
    b2_ref: (1, Lp)  f32
    o_ref : (TB, Lp) f32   logits; same block across the N axis -> accumulator
    """
    n = pl.program_id(1)

    # Initialize the resident logits block with the out_proj bias on the first
    # N-chunk of each batch tile.
    @pl.when(n == 0)
    def _init():
        o_ref[...] = jnp.broadcast_to(b2_ref[...], o_ref.shape)

    # dense -> tanh for this N-chunk (dropout == identity at inference).
    # bf16 MXU operands, f32 accumulate / bias / tanh.
    h = jnp.tanh(
        jnp.dot(x_ref[...], w1_ref[...], preferred_element_type=jnp.float32)
        + b1_ref[...])

    # out_proj contribution of this chunk, accumulated in f32 in the output
    # block.  The full (TB, 4H) f32 activation is never materialized.
    o_ref[...] += jnp.dot(h.astype(w2_ref.dtype), w2_ref[...],
                          preferred_element_type=jnp.float32)
    # TODO(synk): training-mode dropout (random masking) not implemented; eval semantics only.


def concat_last_four_pooling_head(hL1, hL2, hL3, hL4, w1_t, b1, w2_t, b2,
                                  *, block_b=256, vmem_budget_bytes=None):
    """hLk: (B, S, H) hidden state of the k-th-from-last layer (hL1 == hs[-1]).
    w1_t: (4H, 4H), b1: (4H,), w2_t: (4H, L), b2: (L,).  Returns (B, L) f32.

    block_b: batch tile (256 fills the 256-wide v6e/v7x MXU; use 128 on v5e).
    """
    B, S, H = hL1.shape
    K = 4 * H                       # concatenated feature dim
    L = w2_t.shape[-1]

    b1 = jnp.reshape(b1, (1, K))
    b2 = jnp.reshape(b2, (1, L))

    # --- CLS pooling + concat + bf16 cast: one small XLA fusion that reads only
    #     the token-0 rows; the kernel then sees a single (B, 4H) operand so the
    #     dense layer is ONE long-K matmul (no in-kernel partial-dot merges). ---
    x = jnp.concatenate([h[:, 0, :] for h in (hL1, hL2, hL3, hL4)],
                        axis=-1).astype(jnp.bfloat16)

    # --- Batch tiling: 16-row alignment (bf16 packs (16,128) per vreg). ---
    TB = min(block_b, _round_up(B, 16))
    Bp = _round_up(B, TB)
    if Bp != B:
        x = jnp.pad(x, ((0, Bp - B), (0, 0)))
    num_b_tiles = Bp // TB

    # --- Lane-dense logits (unmasked stores); padding sliced off below. ---
    Lp = _round_up(L, 128)

    # --- VMEM budgeting.  Prefer a whole-resident, SINGLE-buffered W1 (fetched
    #     from HBM exactly once); fall back to tiling W1's output dim (N) when
    #     that would not fit (e.g. H>=1024 on v7x's 64 MiB VMEM/TC). ---
    try:
        phys_vmem = int(pltpu.get_tpu_info().vmem_capacity_bytes)
    except Exception:
        phys_vmem = 64 * 2**20          # conservative (v7x-sized) default
    if vmem_budget_bytes is None:
        vmem_budget_bytes = int(phys_vmem * 0.65)

    Np0 = _round_up(K, 128)

    def footprint(tn, wbuf):
        # Estimated VMEM bytes for one pipelined grid step.
        return (2 * TB * K * 2                              # x (bf16, 2 buffers)
                + wbuf * (K * tn * 2                        # W1 block(s)
                          + 8 * tn * 4                      # b1 block(s), sublane-padded
                          + tn * Lp * 2)                    # W2 block(s)
                + 8 * Lp * 4                                # b2
                + 2 * TB * Lp * 4                           # logits (f32, 2 buffers)
                + TB * tn * 4                               # f32 `h` intermediate
                + 2 * 2**20)                                # compiler temps / slack

    if footprint(Np0, 1) <= vmem_budget_bytes:
        TN = Np0                      # whole-resident W1, single-buffered
    else:
        TN = 128                      # last-resort chunk
        for cand in (4096, 2048, 1024, 512, 256):
            if cand < Np0 and footprint(cand, 2) <= vmem_budget_bytes:
                TN = cand
                break
    Np = _round_up(K, TN)
    num_n_tiles = Np // TN

    # --- Zero-pad weights/biases to the tiled/lane-dense shapes.  Padded dense
    #     columns feed zero rows of W2, so they contribute nothing to logits. ---
    w1p = jnp.pad(w1_t, ((0, 0), (0, Np - K))).astype(jnp.bfloat16)        # (K, Np)
    b1p = jnp.pad(b1, ((0, 0), (0, Np - K))).astype(jnp.float32)           # (1, Np)
    w2p = jnp.pad(w2_t, ((0, Np - K), (0, Lp - L))).astype(jnp.bfloat16)   # (Np, Lp)
    b2p = jnp.pad(b2, ((0, 0), (0, Lp - L))).astype(jnp.float32)           # (1, Lp)

    # --- BlockSpecs.  Grid-invariant blocks are single-buffered so the big W1
    #     block is not duplicated in VMEM; N-chunked blocks keep the default
    #     double-buffering so chunk DMAs overlap MXU work. ---
    x_spec = pl.BlockSpec((TB, K), lambda i, n: (i, 0))
    w_mode = dict(pipeline_mode=pl.Buffered(1)) if num_n_tiles == 1 else {}
    w1_spec = pl.BlockSpec((K, TN), lambda i, n: (0, n), **w_mode)
    b1_spec = pl.BlockSpec((1, TN), lambda i, n: (0, n), **w_mode)
    w2_spec = pl.BlockSpec((TN, Lp), lambda i, n: (n, 0), **w_mode)
    b2_spec = pl.BlockSpec((1, Lp), lambda i, n: (0, 0),
                           pipeline_mode=pl.Buffered(1))
    out_spec = pl.BlockSpec((TB, Lp), lambda i, n: (i, 0))

    # Explicit scoped-VMEM limit sized to the actual footprint (floor 32 MiB so
    # we never go below the platform defaults; capped at physical VMEM).
    vmem_limit = int(min(phys_vmem,
                         max(32 * 2**20,
                             footprint(TN, 1 if num_n_tiles == 1 else 2)
                             + 4 * 2**20)))

    # Megacore: only shard the batch axis when there is enough work that the
    # per-core weight duplication pays off; the N axis carries the logits
    # accumulator and must stay "arbitrary".
    batch_sem = "parallel" if num_b_tiles > 2 else "arbitrary"

    weight_bytes = (K * Np + Np * Lp) * 2
    weight_fetches = 1 if num_n_tiles == 1 else num_b_tiles
    cost = pl.CostEstimate(
        flops=2 * Bp * K * Np + 2 * Bp * Np * Lp,
        transcendentals=Bp * Np,
        bytes_accessed=(Bp * K * 2                 # CLS features (bf16)
                        + weight_fetches * weight_bytes
                        + (Np + Lp) * 4            # biases (f32)
                        + Bp * Lp * 4),            # logits (f32)
    )

    out = pl.pallas_call(
        concat4_head_kernel,
        out_shape=jax.ShapeDtypeStruct((Bp, Lp), jnp.float32),
        grid=(num_b_tiles, num_n_tiles),
        in_specs=[x_spec, w1_spec, b1_spec, w2_spec, b2_spec],
        out_specs=out_spec,
        compiler_params=pltpu.CompilerParams(
            dimension_semantics=(batch_sem, "arbitrary"),
            vmem_limit_bytes=vmem_limit),
        cost_estimate=cost,
    )(x, w1p, b1p, w2p, b2p)

    # Strip batch padding and label-lane padding.
    return out[:B, :L]


if __name__ == "__main__":
    # Small synthetic shapes: batch=2, seq=8, hidden=32 -> concat dim 4H=128, num_labels=4.
    B, S, H, L = 2, 8, 32, 4
    H4 = 4 * H

    key = jax.random.PRNGKey(0)
    k_h1, k_h2, k_h3, k_h4, k_w1, k_b1, k_w2, k_b2 = jax.random.split(key, 8)

    # "all_hidden_states" of the last four transformer layers (synthetic).
    hL1 = jax.random.normal(k_h1, (B, S, H), jnp.float32)  # hs[-1]
    hL2 = jax.random.normal(k_h2, (B, S, H), jnp.float32)  # hs[-2]
    hL3 = jax.random.normal(k_h3, (B, S, H), jnp.float32)  # hs[-3]
    hL4 = jax.random.normal(k_h4, (B, S, H), jnp.float32)  # hs[-4]

    # Classifier head params, deterministic init.
    # PyTorch nn.Linear stores weight as (out, in); we keep the transposed (in, out) form.
    w1_t = 0.02 * jax.random.normal(k_w1, (H4, H4), jnp.float32)   # dense
    b1 = 0.02 * jax.random.normal(k_b1, (H4,), jnp.float32)
    w2_t = 0.02 * jax.random.normal(k_w2, (H4, L), jnp.float32)    # out_proj
    b2 = 0.02 * jax.random.normal(k_b2, (L,), jnp.float32)

    logits = concat_last_four_pooling_head(hL1, hL2, hL3, hL4, w1_t, b1, w2_t, b2)
    logits = jax.block_until_ready(logits)
    assert logits.shape == (B, L)

    # Reference #1: mirrors the kernel's bf16-operand / f32-accumulate math.
    x_bf = jnp.concatenate([hL1[:, 0], hL2[:, 0], hL3[:, 0], hL4[:, 0]],
                           axis=-1).astype(jnp.bfloat16)
    h_ref = jnp.tanh(jnp.dot(x_bf, w1_t.astype(jnp.bfloat16),
                             preferred_element_type=jnp.float32) + b1)
    ref_bf = jnp.dot(h_ref.astype(jnp.bfloat16), w2_t.astype(jnp.bfloat16),
                     preferred_element_type=jnp.float32) + b2
    assert jnp.allclose(logits, ref_bf, atol=5e-3, rtol=5e-3), \
        float(jnp.max(jnp.abs(logits - ref_bf)))

    # Reference #2: full-f32 math (looser tolerance due to bf16 MXU operands).
    x_f32 = jnp.concatenate([hL1[:, 0], hL2[:, 0], hL3[:, 0], hL4[:, 0]], axis=-1)
    ref_f32 = jnp.tanh(x_f32 @ w1_t + b1) @ w2_t + b2
    assert jnp.allclose(logits, ref_f32, atol=1e-2, rtol=1e-2), \
        float(jnp.max(jnp.abs(logits - ref_f32)))

    print("KERNEL_OK")
</pallas_src>

<mosaic_0001>
module attributes {stable_mosaic.version = 11 : i64} {
  func.func @concat4_head_kernel(%arg0: i32, %arg1: i32, %arg2: memref<16x128xbf16, #tpu.memory_space<vmem>>, %arg3: memref<128x128xbf16, #tpu.memory_space<vmem>>, %arg4: memref<1x128xf32, #tpu.memory_space<vmem>>, %arg5: memref<128x128xbf16, #tpu.memory_space<vmem>>, %arg6: memref<1x128xf32, #tpu.memory_space<vmem>>, %arg7: memref<16x128xf32, #tpu.memory_space<vmem>>) attributes {dimension_semantics = [#tpu.dimension_semantics<arbitrary>, #tpu.dimension_semantics<arbitrary>], iteration_bounds = array<i64: 1, 1>, scalar_prefetch = 0 : i64, scratch_operands = 0 : i64, tpu.core_type = #tpu.core_type<tc>, window_params = [{transform_indices = @transform_0, window_bounds = array<i64: 16, 128>}, {pipeline_mode = #tpu.pipeline_mode<synchronous>, transform_indices = @transform_1, window_bounds = array<i64: 128, 128>}, {pipeline_mode = #tpu.pipeline_mode<synchronous>, transform_indices = @transform_2, window_bounds = array<i64: 1, 128>}, {pipeline_mode = #tpu.pipeline_mode<synchronous>, transform_indices = @transform_3, window_bounds = array<i64: 128, 128>}, {pipeline_mode = #tpu.pipeline_mode<synchronous>, transform_indices = @transform_4, window_bounds = array<i64: 1, 128>}, {transform_indices = @transform_5, window_bounds = array<i64: 16, 128>}]} {
    %c0_i32 = arith.constant 0 : i32
    %0 = arith.cmpi eq, %arg1, %c0_i32 : i32
    %1 = arith.extui %0 : i1 to i32
    %c0_i32_0 = arith.constant 0 : i32
    %2 = arith.cmpi ne, %1, %c0_i32_0 : i32
    scf.if %2 {
      %c0_13 = arith.constant 0 : index
      %c0_14 = arith.constant 0 : index
      %16 = vector.load %arg6[%c0_13, %c0_14] : memref<1x128xf32, #tpu.memory_space<vmem>>, vector<1x128xf32>
      %17 = vector.shape_cast %16 : vector<1x128xf32> to vector<1x128xf32>
      %18 = vector.broadcast %17 : vector<1x128xf32> to vector<16x128xf32>
      %c0_15 = arith.constant 0 : index
      %c0_16 = arith.constant 0 : index
      %19 = vector.load %arg7[%c0_15, %c0_16] : memref<16x128xf32, #tpu.memory_space<vmem>>, vector<16x128xf32>
      tpu.vector_store %arg7[%c0_15, %c0_16], %18 {strides = array<i32>} : memref<16x128xf32, #tpu.memory_space<vmem>>, vector<16x128xf32>,
    } else {
    }
    %c0 = arith.constant 0 : index
    %c0_1 = arith.constant 0 : index
    %3 = vector.load %arg2[%c0, %c0_1] : memref<16x128xbf16, #tpu.memory_space<vmem>>, vector<16x128xbf16>
    %c0_2 = arith.constant 0 : index
    %c0_3 = arith.constant 0 : index
    %4 = vector.load %arg3[%c0_2, %c0_3] : memref<128x128xbf16, #tpu.memory_space<vmem>>, vector<128x128xbf16>
    %cst = arith.constant dense<0.000000e+00> : vector<16x128xf32>
    %5 = tpu.matmul %3, %4, %cst {dimension_numbers = #tpu.dot_dimension_numbers<[1], [0], [0], [1], [0, 0, 1, 1], [], []>} : vector<16x128xbf16>, vector<128x128xbf16>, vector<16x128xf32> -> vector<16x128xf32>
    %c0_4 = arith.constant 0 : index
    %c0_5 = arith.constant 0 : index
    %6 = vector.load %arg4[%c0_4, %c0_5] : memref<1x128xf32, #tpu.memory_space<vmem>>, vector<1x128xf32>
    %7 = vector.broadcast %6 : vector<1x128xf32> to vector<16x128xf32>
    %8 = arith.addf %5, %7 : vector<16x128xf32>
    %9 = math.tanh %8 : vector<16x128xf32>
    %c0_6 = arith.constant 0 : index
    %c0_7 = arith.constant 0 : index
    %10 = vector.load %arg7[%c0_6, %c0_7] : memref<16x128xf32, #tpu.memory_space<vmem>>, vector<16x128xf32>
    %11 = arith.truncf %9 : vector<16x128xf32> to vector<16x128xbf16>
    %c0_8 = arith.constant 0 : index
    %c0_9 = arith.constant 0 : index
    %12 = vector.load %arg5[%c0_8, %c0_9] : memref<128x128xbf16, #tpu.memory_space<vmem>>, vector<128x128xbf16>
    %cst_10 = arith.constant dense<0.000000e+00> : vector<16x128xf32>
    %13 = tpu.matmul %11, %12, %cst_10 {dimension_numbers = #tpu.dot_dimension_numbers<[1], [0], [0], [1], [0, 0, 1, 1], [], []>} : vector<16x128xbf16>, vector<128x128xbf16>, vector<16x128xf32> -> vector<16x128xf32>
    %14 = arith.addf %10, %13 : vector<16x128xf32>
    %c0_11 = arith.constant 0 : index
    %c0_12 = arith.constant 0 : index
    %15 = vector.load %arg7[%c0_11, %c0_12] : memref<16x128xf32, #tpu.memory_space<vmem>>, vector<16x128xf32>
    tpu.vector_store %arg7[%c0_11, %c0_12], %14 {strides = array<i32>} : memref<16x128xf32, #tpu.memory_space<vmem>>, vector<16x128xf32>,
    return
  }
  func.func @transform_0(%arg0: i32, %arg1: i32) -> (i32, i32) {
    %c0_i32 = arith.constant 0 : i32
    %c0_i32_0 = arith.constant 0 : i32
    return %arg0, %c0_i32 : i32, i32
  }
  func.func @transform_1(%arg0: i32, %arg1: i32) -> (i32, i32) {
    %c0_i32 = arith.constant 0 : i32
    %c0_i32_0 = arith.constant 0 : i32
    return %c0_i32, %arg1 : i32, i32
  }
  func.func @transform_2(%arg0: i32, %arg1: i32) -> (i32, i32) {
    %c0_i32 = arith.constant 0 : i32
    %c0_i32_0 = arith.constant 0 : i32
    return %c0_i32, %arg1 : i32, i32
  }
  func.func @transform_3(%arg0: i32, %arg1: i32) -> (i32, i32) {
    %c0_i32 = arith.constant 0 : i32
    %c0_i32_0 = arith.constant 0 : i32
    return %arg1, %c0_i32 : i32, i32
  }
  func.func @transform_4(%arg0: i32, %arg1: i32) -> (i32, i32) {
    %c0_i32 = arith.constant 0 : i32
    %c0_i32_0 = arith.constant 0 : i32
    %c0_i32_1 = arith.constant 0 : i32
    return %c0_i32, %c0_i32_0 : i32, i32
  }
  func.func @transform_5(%arg0: i32, %arg1: i32) -> (i32, i32) {
    %c0_i32 = arith.constant 0 : i32
    %c0_i32_0 = arith.constant 0 : i32
    return %arg0, %c0_i32 : i32, i32
  }
}

</mosaic_0001>

<bundles_post_ra>
// kernel: tpu_custom_call.1
= control target key start
LH: loop header
LB: loop body
LE: loop exit
PB: predicated region body
PF: predicated region fallthrough
CT: control target
= control target key end

     0   :  { %10 = vsyncpa [#allocation3], 0  ;;  %s640_s0 = inlined_call_operand.hbm [shape: bf16[16,128], index: 0, kind: input, shape index: {}]   ;;  %s641_s1 = inlined_call_operand.hbm [shape: bf16[128,128], index: 1, kind: input, shape index: {}]   ;;  %s642_s2 = inlined_call_operand.vmem [shape: f32[1,128], index: 2, kind: input, shape index: {}]   ;;  %s643_s3 = inlined_call_operand.hbm [shape: bf16[128,128], index: 3, kind: input, shape index: {}]   ;;  %s644_s4 = inlined_call_operand.vmem [shape: f32[1,128], index: 4, kind: input, shape index: {}]   ;;  %s645_s5 = inlined_call_operand.hbm [shape: f32[16,128], index: 5, kind: output, shape index: {}]  }
   0x1   :  { %11 = vsyncpa [#allocation6], 0 }
   0x2   :  { %12 = vsyncpa [#allocation4], 0  ;;  %s530_s18 = smov [#allocation5]   ;;  %s531_s20 = smov [#allocation2]  }
   0x3   :  { %s30_s19 = sshll.u32 %s530_s18, 4  ;;  %s18_s21 = sshll.u32 %s531_s20, 4  ;;  %s31_s19 = int_to_ptr.vmem [resolvable:$true] %s30_s19  ;;  %s570_s21 = int_to_ptr.vmem [resolvable:$true] %s18_s21 }
   0x4   :  { %s436_s24 = scalar_lea.hbm %s641_s1, 1024 }
   0x5   :  { %p437_p0 = scmp.ne.s32.totalorder %s641_s1, %s436_s24  ;;  %p440_p1 = scmp.lt.u32.totalorder %s436_s24, %s641_s1 }
   0x7   :  { %p442_p2 = pnand %p440_p1, %p437_p0 }
   0x9   :  { %445 = shalt.err (!%p442_p2)
}
   0xa   :  { %s446_s29 = scalar_lea.vmem %s31_s19, 1024  ;;  %p451_p4 = scmp.lt.s32.totalorder %s31_s19, %s31_s19 }
   0xb   :  { %p447_p3 = scmp.ne.s32.totalorder %s31_s19, %s446_s29  ;;  %p452_p5 = scmp.lt.s32.totalorder %s446_s29, %s446_s29 }
   0xd   :  { %p453_p6 = por %p452_p5, %p451_p4 }
   0xf   :  { %p454_p7 = pnand %p453_p6, %p447_p3 }
  0x11   :  { %457 = shalt.err (!%p454_p7)
}
  0x12   :  { %s532_s30 = smov 64   ;;  %s533_s6 = smov 4  }
  0x13   :  { %36 = dma.hbm_to_vmem [thread:$0]  %s641_s1, 1024, %s31_s19, [#allocation6], %s532_s30, %s532_s30, %s533_s6  }
  0x14   :  { %s458_s11 = scalar_lea.hbm %s640_s0, 128 }
  0x15   :  { %p459_p8 = scmp.ne.s32.totalorder %s640_s0, %s458_s11  ;;  %p462_p9 = scmp.lt.u32.totalorder %s458_s11, %s640_s0 }
  0x17   :  { %p464_p10 = pnand %p462_p9, %p459_p8 }
  0x19   :  { %467 = shalt.err (!%p464_p10)
}
  0x1a   :  { %s468_s16 = scalar_lea.vmem %s570_s21, 128  ;;  %p473_p12 = scmp.lt.s32.totalorder %s570_s21, %s570_s21 }
  0x1b   :  { %p469_p11 = scmp.ne.s32.totalorder %s570_s21, %s468_s16  ;;  %p474_p13 = scmp.lt.s32.totalorder %s468_s16, %s468_s16 }
  0x1d   :  { %p475_p0 = por %p474_p13, %p473_p12 }
  0x1f   :  { %p476_p1 = pnand %p475_p0, %p469_p11 }
  0x21   :  { %479 = shalt.err (!%p476_p1)
}
  0x22   :  { %24 = dma.hbm_to_vmem [thread:$0]  %s640_s0, 128, %s570_s21, [#allocation3], %s532_s30, %s532_s30, %s533_s6  }
  0x23   :  { %s534_s18 = smov [#allocation7]   ;;  %s480_s23 = scalar_lea.hbm %s643_s3, 1024 }
  0x24   :  { %s44_s19 = sshll.u32 %s534_s18, 4  ;;  %p481_p2 = scmp.ne.s32.totalorder %s643_s3, %s480_s23  ;;  %s45_s19 = int_to_ptr.vmem [resolvable:$true] %s44_s19 }
  0x25   :  { %p484_p3 = scmp.lt.u32.totalorder %s480_s23, %s643_s3 }
  0x27   :  { %p486_p4 = pnand %p484_p3, %p481_p2 }
  0x29   :  { %489 = shalt.err (!%p486_p4)
}
  0x2a   :  { %s490_s28 = scalar_lea.vmem %s45_s19, 1024  ;;  %p495_p6 = scmp.lt.s32.totalorder %s45_s19, %s45_s19 }
  0x2b   :  { %p491_p5 = scmp.ne.s32.totalorder %s45_s19, %s490_s28  ;;  %p496_p7 = scmp.lt.s32.totalorder %s490_s28, %s490_s28 }
  0x2d   :  { %p497_p8 = por %p496_p7, %p495_p6 }
  0x2f   :  { %p498_p9 = pnand %p497_p8, %p491_p5 }
  0x31   :  { %501 = shalt.err (!%p498_p9)
}
  0x32   :  { %50 = dma.hbm_to_vmem [thread:$0]  %s643_s3, 1024, %s45_s19, [#allocation6], %s532_s30, %s532_s30, %s533_s6  }
  0x33   :  { %524 = dma.done.wait [#allocation3], 128  }
  0x34   :  { %525 = vsyncadd [#allocation3], 4294967168 }
  0x35   :  { %526 = dma.done.wait [#allocation6], 2048  }
  0x36   :  { %527 = vsyncadd [#allocation6], 4294965248  ;;  %v535_v0 = vmov 0.0   ;;  %vm536_vm0 = vmmov 0   ;;  %v415_v1 = vld [vmem:[#allocation5] sm:$0xff]   ;;  %v416_v2 = vld [vmem:[#allocation5 + $0x8] sm:$0xff]  }
  0x37   :  { %365 = vmatprep.subr.bf16.mxu0 %v535_v0  ;;  %381 = vmatprep.mubr.msk.bf16.mxu0 %vm536_vm0, %v535_v0  ;;  %v417_v3 = vld [vmem:[#allocation5 + $0x10] sm:$0xff]   ;;  %v424_v4 = vld [vmem:[#allocation7] sm:$0xff]   ;;  %v418_v5 = vld [vmem:[#allocation5 + $0x18] sm:$0xff]   ;;  %s537_s7 = smov [#allocation8]  }
  0x38   :  { %385 = vmatprep.subr.bf16.mxu1 %v535_v0  ;;  %401 = vmatprep.mubr.msk.bf16.mxu1 %vm536_vm0, %v535_v0  ;;  %v425_v6 = vld [vmem:[#allocation7 + $0x8] sm:$0xff]   ;;  %v419_v7 = vld [vmem:[#allocation5 + $0x20] sm:$0xff]   ;;  %v426_v8 = vld [vmem:[#allocation7 + $0x10] sm:$0xff]   ;;  %s315_s8 = sshll.u32 %s537_s7, 4  ;;  %s316_s8 = int_to_ptr.vmem [resolvable:$true] %s315_s8 }
  0x39   :  { %366 = vmatpush3.bf16.msra.mxu0 %v415_v1  ;;  %386 = vmatpush3.bf16.msra.mxu1 %v424_v4  ;;  %v420_v9 = vld [vmem:[#allocation5 + $0x28] sm:$0xff]   ;;  %v427_v10 = vld [vmem:[#allocation7 + $0x18] sm:$0xff]   ;;  %v421_v11 = vld [vmem:[#allocation5 + $0x30] sm:$0xff]   ;;  %p507_p11 = scmp.lt.s32.totalorder %s316_s8, %s316_s8 }
  0x3a   :  { %367 = vmatprep.subr.bf16.mxu0 %v535_v0  ;;  %387 = vmatprep.subr.bf16.mxu1 %v535_v0  ;;  %v422_v12 = vld [vmem:[#allocation5 + $0x38] sm:$0xff]   ;;  %v428_v14 = vld [vmem:[#allocation7 + $0x20] sm:$0xff]   ;;  %v429_v15 = vld [vmem:[#allocation7 + $0x28] sm:$0xff]  }
  0x3b   :  { %v423_v13 = vld [vmem:[#allocation2] sm:$0xff]   ;;  %v430_v16 = vld [vmem:[#allocation7 + $0x30] sm:$0xff]  }
  0x3c   :  { %v431_v17 = vld [vmem:[#allocation7 + $0x38] sm:$0xff]  }
  0x3d   :  { %368 = vmatpush3.bf16.msra.mxu0 %v416_v2  ;;  %388 = vmatpush3.bf16.msra.mxu1 %v425_v6  ;;  %v329_v18 = vld [vmem:[%s642_s2] ss:$0 sm:$0xff]  ;;  %s502_s2 = scalar_lea.vmem %s316_s8, 256 }
  0x3e   :  { %369 = vmatprep.subr.bf16.mxu0 %v535_v0  ;;  %389 = vmatprep.subr.bf16.mxu1 %v535_v0  ;;  %v328_v28 = vld [vmem:[%s644_s4] ss:$0 sm:$0xff]  ;;  %p503_p10 = scmp.ne.s32.totalorder %s316_s8, %s502_s2  ;;  %p508_p12 = scmp.lt.s32.totalorder %s502_s2, %s502_s2 }
  0x40   :  { %p509_p13 = por %p508_p12, %p507_p11 }
  0x41   :  { %370 = vmatpush3.bf16.msra.mxu0 %v417_v3  ;;  %390 = vmatpush3.bf16.msra.mxu1 %v426_v8 }
  0x42   :  { %371 = vmatprep.subr.bf16.mxu0 %v535_v0  ;;  %391 = vmatprep.subr.bf16.mxu1 %v535_v0  ;;  %p510_p0 = pnand %p509_p13, %p503_p10 }
  0x45   :  { %372 = vmatpush3.bf16.msra.mxu0 %v418_v5  ;;  %392 = vmatpush3.bf16.msra.mxu1 %v427_v10 }
  0x46   :  { %373 = vmatprep.subr.bf16.mxu0 %v535_v0  ;;  %393 = vmatprep.subr.bf16.mxu1 %v535_v0 }
  0x49   :  { %374 = vmatpush3.bf16.msra.mxu0 %v419_v7  ;;  %394 = vmatpush3.bf16.msra.mxu1 %v428_v14 }
  0x4a   :  { %375 = vmatprep.subr.bf16.mxu0 %v535_v0  ;;  %395 = vmatprep.subr.bf16.mxu1 %v535_v0 }
  0x4d   :  { %376 = vmatpush3.bf16.msra.mxu0 %v420_v9  ;;  %396 = vmatpush3.bf16.msra.mxu1 %v429_v15 }
  0x4e   :  { %377 = vmatprep.subr.bf16.mxu0 %v535_v0  ;;  %397 = vmatprep.subr.bf16.mxu1 %v535_v0 }
  0x51   :  { %378 = vmatpush3.bf16.msra.mxu0 %v421_v11  ;;  %398 = vmatpush3.bf16.msra.mxu1 %v430_v16 }
  0x52   :  { %379 = vmatprep.subr.bf16.mxu0 %v535_v0  ;;  %399 = vmatprep.subr.bf16.mxu1 %v535_v0 }
  0x55   :  { %380 = vmatpush3.bf16.msra.mxu0 %v422_v12  ;;  %400 = vmatpush3.bf16.msra.mxu1 %v431_v17 }
  0x58   :  { %382 = vmatmul.mubr.bf16.vlgmr.msra.gmra.mrb[0].mxu0 %v423_v13 }
 0x12b   :  { %v189_v19 = vpop.f32.mrb[0].mxu0 }
 0x12c   :  { %v190_v20 = vadd.f32 %v329_v18, %v189_v19  ;;  %v383_v21 = vpop.f32.mrb[1].mxu0 }
 0x12d   :  { %v192_v22 = vpop.f32.mrb[2].mxu0 }
 0x12e   :  { %v193_v23 = vadd.f32 %v329_v18, %v192_v22  ;;  %v384_v24 = vpop.f32.mrb[3].mxu0  ;;  %432 = vtanh.f32 %v190_v20 }
 0x130   :  { %434 = vtanh.f32 %v193_v23 }
 0x138   :  { %v433_v25 = vpop.eup %432 }
 0x13a   :  { %v435_v26 = vpop.eup %434 }
 0x13b   :  { %v200_v27 = vpack.c.bf16 %v435_v26, %v433_v25 }
 0x13d   :  { %402 = vmatmul.mubr.bf16.vlgmr.msra.gmra.mrb[0].mxu1 %v200_v27 }
 0x210   :  { %v299_v29 = vpop.f32.mrb[0].mxu1 }
 0x211   :  { %v306_v30 = vadd.f32 %v328_v28, %v299_v29  ;;  %v403_v31 = vpop.f32.mrb[1].mxu1 }
 0x212   :  { %v302_v32 = vpop.f32.mrb[2].mxu1 }
 0x213   :  { %308 = vst [vmem:[#allocation8] sm:$0xff] %v306_v30  ;;  %v307_v33 = vadd.f32 %v328_v28, %v302_v32  ;;  %v404_v34 = vpop.f32.mrb[3].mxu1 }
 0x215   :  { %309 = vst [vmem:[#allocation8 + $0x8] sm:$0xff] %v307_v33 }
 0x216   :  { %513 = shalt.err (!%p510_p0)
}
 0x217   :  { %s514_s10 = scalar_lea.hbm %s645_s5, 256 }
 0x218   :  { %p515_p1 = scmp.ne.s32.totalorder %s645_s5, %s514_s10  ;;  %p518_p2 = scmp.lt.u32.totalorder %s514_s10, %s645_s5 }
 0x21a   :  { %p520_p3 = pnand %p518_p2, %p515_p1 }
 0x21c   :  { %523 = shalt.err (!%p520_p3)
}
 0x21d   :  { %s538_s15 = smov 128   ;;  %s539_s16 = smov 8  }
 0x21e   :  { %321 = dma.vmem_to_hbm [thread:$0]  %s316_s8, 256, %s645_s5, [#allocation4], %s538_s15, %s538_s15, %s539_s16  }
 0x21f   :  { %528 = dma.done.wait [#allocation4], 256  }
 0x220   :  { %529 = vsyncadd [#allocation4], 4294967040 }
 0x221   :  { %325 = vsyncpa [#allocation3], 1 }
 0x222   :  { %326 = vsyncpa [#allocation6], 1 }
 0x223   :  { %327 = vsyncpa [#allocation4], 1 }

</bundles_post_ra>
